<compile_context>
chip_gen: v6e
topology: v6e:2x2x1
jax: 0.10.0
libtpu: 0.0.40
codegen_flags: <defaults>
</compile_context>

<pallas_src>
import jax
import jax.numpy as jnp
from jax.experimental import pallas as pl
from jax.experimental.pallas import tpu as pltpu

# ---------------- configuration (small, consistent with the module) --------
B = 2                                  # batch
C = 4                                  # input_dim
RES = 16                               # input_res
P = 4                                  # patch_size
DIM, DIM_HEAD, DIM_MLP = 32, 16, 64    # filters = (dim, dim_head, dim_mlp)
NUM_CLS = 3                            # num_cls == attention heads
N = (RES // P) * (RES // P)            # num_patches = 16
PATCH_DIM = C * P * P                  # 64
INNER = NUM_CLS * DIM_HEAD             # 48
SCALE = DIM_HEAD ** -0.5


# ---------------------------- Pallas kernel --------------------------------
def token_head_kernel(patches_ref, w_emb_ref, pos_ref, qblk_ref, mask_ref,
                      w_k_ref, w_v_ref, w_out_ref, b_out_ref,
                      w1_ref, b1_ref, w2_ref, b2_ref,
                      tok_out_ref, attn_out_ref):
    # patch embedding for the whole batch in one MXU pass:
    # (B*N, PATCH_DIM) x (PATCH_DIM, DIM); pos_ref already includes b_emb.
    tokens = (jnp.dot(patches_ref[...], w_emb_ref[...],
                      preferred_element_type=jnp.float32)
              + pos_ref[...])                                   # (B*N, DIM)

    # K / V from pre-split weights (no lane-offset slicing in-kernel).
    k = jnp.dot(tokens, w_k_ref[...],
                preferred_element_type=jnp.float32)             # (B*N, INNER)
    v = jnp.dot(tokens, w_v_ref[...],
                preferred_element_type=jnp.float32)             # (B*N, INNER)
    k = k.reshape(B, N, INNER)
    v = v.reshape(B, N, INNER)

    # Batched-head scores via block-diagonal query matrix (one dot per sample
    # instead of one per head, no explicit transpose of K).
    s = jnp.einsum('bhi,bni->bhn', qblk_ref[...], k,
                   preferred_element_type=jnp.float32) * SCALE  # (B, H, N)
    s = s - jnp.max(s, axis=-1, keepdims=True)
    e = jnp.exp(s)
    denom = jnp.sum(e, axis=-1, keepdims=True)
    inv = pl.reciprocal(denom, approx=True)        # EUP slot (otherwise idle)
    inv = inv * (2.0 - denom * inv)                # one Newton step -> ~exact
    attn = e * inv                                              # (B, H, N)
    attn_out_ref[...] = attn                       # single consolidated store

    o = jnp.einsum('bhn,bni->bhi', attn, v,
                   preferred_element_type=jnp.float32)          # (B, H, INNER)
    # Per-head block extraction == block-mask multiply + sum over heads (VPU).
    out = jnp.sum(o * mask_ref[...][None, :, :], axis=1)        # (B, INNER)

    # output projection + feed-forward (dim -> dim_mlp -> dim) with residual
    out = jnp.dot(out, w_out_ref[...],
                  preferred_element_type=jnp.float32) + b_out_ref[...]
    h1 = jax.nn.gelu(jnp.dot(out, w1_ref[...],
                             preferred_element_type=jnp.float32) + b1_ref[...])
    out = out + jnp.dot(h1, w2_ref[...],
                        preferred_element_type=jnp.float32) + b2_ref[...]

    tok_out_ref[...] = out                                      # (B, DIM)


# ------------------------------ wrapper -------------------------------------
def _full_spec(shape):
    """BlockSpec covering the whole array (single grid step)."""
    nd = len(shape)
    return pl.BlockSpec(shape, lambda i, _nd=nd: (0,) * _nd)


@jax.jit
def token_head_forward(img, params):
    """img: (B, C, RES, RES) NCHW float32.  Returns (tokens (B,1,DIM), attn)."""
    b = img.shape[0]
    hh = ww = RES // P
    # einops 'b c (h p1) (w p2) -> b (h w) (p1 p2 c)', batch flattened.
    patches = (img.reshape(b, C, hh, P, ww, P)
                  .transpose(0, 2, 4, 3, 5, 1)
                  .reshape(b * N, PATCH_DIM))

    # Wrapper-side (trace-time) folds — free relative to the kernel body.
    pos_plus = jnp.tile(params["pos"][0] + params["b_emb"], (b, 1))    # (B*N, DIM)
    mask = (jnp.arange(INNER)[None, :] // DIM_HEAD
            == jnp.arange(NUM_CLS)[:, None]).astype(jnp.float32)       # (H, INNER)
    q_blk = jnp.tile(params["q"], (1, NUM_CLS)) * mask                 # block-diag q
    q_blk = jnp.broadcast_to(q_blk, (b, NUM_CLS, INNER))               # (B, H, INNER)
    w_k = params["w_kv"][:, :INNER]
    w_v = params["w_kv"][:, INNER:]

    weight_args = (params["w_emb"], pos_plus, q_blk, mask, w_k, w_v,
                   params["w_out"], params["b_out"],
                   params["w1"], params["b1"], params["w2"], params["b2"])

    in_specs = [_full_spec(patches.shape)]
    in_specs += [_full_spec(w.shape) for w in weight_args]
    out_specs = [_full_spec((b, DIM)),
                 _full_spec((b, NUM_CLS, N))]

    tokens, attn = pl.pallas_call(
        token_head_kernel,
        out_shape=(jax.ShapeDtypeStruct((b, DIM), jnp.float32),
                   jax.ShapeDtypeStruct((b, NUM_CLS, N), jnp.float32)),
        grid=(1,),                       # grid collapsed: one invocation
        in_specs=in_specs,
        out_specs=out_specs,
        compiler_params=pltpu.CompilerParams(
            dimension_semantics=("arbitrary",)),
    )(patches, *weight_args)
    return tokens[:, None, :], attn


# --------------------------- pure-JAX reference ------------------------------
def ref_forward(img, p):
    b = img.shape[0]
    hh = ww = RES // P
    patches = (img.reshape(b, C, hh, P, ww, P)
                  .transpose(0, 2, 4, 3, 5, 1)
                  .reshape(b, N, PATCH_DIM))
    tokens = patches @ p["w_emb"] + p["b_emb"] + p["pos"]
    kv = tokens @ p["w_kv"]
    k = kv[..., :INNER].reshape(b, N, NUM_CLS, DIM_HEAD)
    v = kv[..., INNER:].reshape(b, N, NUM_CLS, DIM_HEAD)
    scores = jnp.einsum("hd,bnhd->bhn", p["q"], k) * SCALE
    attn = jax.nn.softmax(scores, axis=-1)
    out = jnp.einsum("bhn,bnhd->bhd", attn, v).reshape(b, 1, INNER)
    out = out @ p["w_out"] + p["b_out"]
    out = out + jax.nn.gelu(out @ p["w1"] + p["b1"]) @ p["w2"] + p["b2"]
    return out, attn


# ------------------------------- main ----------------------------------------
def init_params(key):
    ks = jax.random.split(key, 11)
    s = lambda k, shape, scale=0.02: (scale * jax.random.normal(k, shape)
                                      ).astype(jnp.float32)
    return {
        "w_emb": s(ks[0], (PATCH_DIM, DIM), 0.05),
        "b_emb": s(ks[1], (1, DIM)),
        "pos":   s(ks[2], (1, N, DIM), 1.0),          # encoder_pos_emb ~ randn
        "q":     s(ks[3], (NUM_CLS, DIM_HEAD), 1.0),  # learnable class queries
        "w_kv":  s(ks[4], (DIM, 2 * INNER), 0.05),
        "w_out": s(ks[5], (INNER, DIM), 0.05),
        "b_out": s(ks[6], (1, DIM)),
        "w1":    s(ks[7], (DIM, DIM_MLP), 0.05),
        "b1":    s(ks[8], (1, DIM_MLP)),
        "w2":    s(ks[9], (DIM_MLP, DIM), 0.05),
        "b2":    s(ks[10], (1, DIM)),
    }


if __name__ == "__main__":
    key = jax.random.PRNGKey(0)
    k_img, k_par = jax.random.split(key)
    img = jax.random.normal(k_img, (B, C, RES, RES), dtype=jnp.float32)
    params = init_params(k_par)

    tokens, attn = token_head_forward(img, params)
    jax.block_until_ready((tokens, attn))

    tokens_ref, attn_ref = ref_forward(img, params)
    assert tokens.shape == (B, 1, DIM) and attn.shape == (B, NUM_CLS, N)
    assert jnp.allclose(tokens, tokens_ref, atol=1e-4, rtol=1e-4)
    assert jnp.allclose(attn, attn_ref, atol=1e-5, rtol=1e-4)
    # attention maps sum to 1 over the token axis (all tokens unmasked in eval)
    assert jnp.allclose(attn.sum(-1), jnp.ones((B, NUM_CLS)), atol=1e-5)

    print("KERNEL_OK")
</pallas_src>

<mosaic_0001>
module attributes {stable_mosaic.version = 11 : i64} {
  func.func @token_head_kernel(%arg0: i32, %arg1: memref<32x64xf32, #tpu.memory_space<vmem>>, %arg2: memref<64x32xf32, #tpu.memory_space<vmem>>, %arg3: memref<32x32xf32, #tpu.memory_space<vmem>>, %arg4: memref<2x3x48xf32, #tpu.memory_space<vmem>>, %arg5: memref<3x48xf32, #tpu.memory_space<vmem>>, %arg6: memref<32x48xf32, #tpu.memory_space<vmem>>, %arg7: memref<32x48xf32, #tpu.memory_space<vmem>>, %arg8: memref<48x32xf32, #tpu.memory_space<vmem>>, %arg9: memref<1x32xf32, #tpu.memory_space<vmem>>, %arg10: memref<32x64xf32, #tpu.memory_space<vmem>>, %arg11: memref<1x64xf32, #tpu.memory_space<vmem>>, %arg12: memref<64x32xf32, #tpu.memory_space<vmem>>, %arg13: memref<1x32xf32, #tpu.memory_space<vmem>>, %arg14: memref<2x32xf32, #tpu.memory_space<vmem>>, %arg15: memref<2x3x16xf32, #tpu.memory_space<vmem>>) attributes {dimension_semantics = [#tpu.dimension_semantics<arbitrary>], iteration_bounds = array<i64: 1>, scalar_prefetch = 0 : i64, scratch_operands = 0 : i64, tpu.core_type = #tpu.core_type<tc>, window_params = [{pipeline_mode = #tpu.pipeline_mode<synchronous>, transform_indices = @transform_0, window_bounds = array<i64: 32, 64>}, {pipeline_mode = #tpu.pipeline_mode<synchronous>, transform_indices = @transform_1, window_bounds = array<i64: 64, 32>}, {pipeline_mode = #tpu.pipeline_mode<synchronous>, transform_indices = @transform_2, window_bounds = array<i64: 32, 32>}, {pipeline_mode = #tpu.pipeline_mode<synchronous>, transform_indices = @transform_3, window_bounds = array<i64: 2, 3, 48>}, {pipeline_mode = #tpu.pipeline_mode<synchronous>, transform_indices = @transform_4, window_bounds = array<i64: 3, 48>}, {pipeline_mode = #tpu.pipeline_mode<synchronous>, transform_indices = @transform_5, window_bounds = array<i64: 32, 48>}, {pipeline_mode = #tpu.pipeline_mode<synchronous>, transform_indices = @transform_6, window_bounds = array<i64: 32, 48>}, {pipeline_mode = #tpu.pipeline_mode<synchronous>, transform_indices = @transform_7, window_bounds = array<i64: 48, 32>}, {pipeline_mode = #tpu.pipeline_mode<synchronous>, transform_indices = @transform_8, window_bounds = array<i64: 1, 32>}, {pipeline_mode = #tpu.pipeline_mode<synchronous>, transform_indices = @transform_9, window_bounds = array<i64: 32, 64>}, {pipeline_mode = #tpu.pipeline_mode<synchronous>, transform_indices = @transform_10, window_bounds = array<i64: 1, 64>}, {pipeline_mode = #tpu.pipeline_mode<synchronous>, transform_indices = @transform_11, window_bounds = array<i64: 64, 32>}, {pipeline_mode = #tpu.pipeline_mode<synchronous>, transform_indices = @transform_12, window_bounds = array<i64: 1, 32>}, {pipeline_mode = #tpu.pipeline_mode<synchronous>, transform_indices = @transform_13, window_bounds = array<i64: 2, 32>}, {pipeline_mode = #tpu.pipeline_mode<synchronous>, transform_indices = @transform_14, window_bounds = array<i64: 2, 3, 16>}]} {
    %c0 = arith.constant 0 : index
    %c0_0 = arith.constant 0 : index
    %0 = vector.load %arg1[%c0, %c0_0] : memref<32x64xf32, #tpu.memory_space<vmem>>, vector<32x64xf32>
    %c0_1 = arith.constant 0 : index
    %c0_2 = arith.constant 0 : index
    %1 = vector.load %arg2[%c0_1, %c0_2] : memref<64x32xf32, #tpu.memory_space<vmem>>, vector<64x32xf32>
    %cst = arith.constant dense<0.000000e+00> : vector<32x32xf32>
    %2 = tpu.matmul %0, %1, %cst {dimension_numbers = #tpu.dot_dimension_numbers<[1], [0], [0], [1], [0, 0, 1, 1], [], []>} : vector<32x64xf32>, vector<64x32xf32>, vector<32x32xf32> -> vector<32x32xf32>
    %c0_3 = arith.constant 0 : index
    %c0_4 = arith.constant 0 : index
    %3 = vector.load %arg3[%c0_3, %c0_4] : memref<32x32xf32, #tpu.memory_space<vmem>>, vector<32x32xf32>
    %4 = arith.addf %2, %3 : vector<32x32xf32>
    %c0_5 = arith.constant 0 : index
    %c0_6 = arith.constant 0 : index
    %5 = vector.load %arg6[%c0_5, %c0_6] : memref<32x48xf32, #tpu.memory_space<vmem>>, vector<32x48xf32>
    %cst_7 = arith.constant dense<0.000000e+00> : vector<32x48xf32>
    %6 = tpu.matmul %4, %5, %cst_7 {dimension_numbers = #tpu.dot_dimension_numbers<[1], [0], [0], [1], [0, 0, 1, 1], [], []>} : vector<32x32xf32>, vector<32x48xf32>, vector<32x48xf32> -> vector<32x48xf32>
    %c0_8 = arith.constant 0 : index
    %c0_9 = arith.constant 0 : index
    %7 = vector.load %arg7[%c0_8, %c0_9] : memref<32x48xf32, #tpu.memory_space<vmem>>, vector<32x48xf32>
    %cst_10 = arith.constant dense<0.000000e+00> : vector<32x48xf32>
    %8 = tpu.matmul %4, %7, %cst_10 {dimension_numbers = #tpu.dot_dimension_numbers<[1], [0], [0], [1], [0, 0, 1, 1], [], []>} : vector<32x32xf32>, vector<32x48xf32>, vector<32x48xf32> -> vector<32x48xf32>
    %9 = vector.shape_cast %6 : vector<32x48xf32> to vector<2x16x48xf32>
    %10 = vector.shape_cast %8 : vector<32x48xf32> to vector<2x16x48xf32>
    %c0_11 = arith.constant 0 : index
    %c0_12 = arith.constant 0 : index
    %c0_13 = arith.constant 0 : index
    %11 = vector.load %arg4[%c0_11, %c0_12, %c0_13] : memref<2x3x48xf32, #tpu.memory_space<vmem>>, vector<2x3x48xf32>
    "tpu.trace_start"() <{level = 10 : i32, message = "bhi,bni->bhn"}> : () -> ()
    %cst_14 = arith.constant dense<0.000000e+00> : vector<2x3x16xf32>
    %12 = tpu.matmul %11, %9, %cst_14 {dimension_numbers = #tpu.dot_dimension_numbers<[2], [2], [1], [1], [0, 0, 0, 1, 1, 1], [0], [0]>} : vector<2x3x48xf32>, vector<2x16x48xf32>, vector<2x3x16xf32> -> vector<2x3x16xf32>
    "tpu.trace_stop"() : () -> ()
    %cst_15 = arith.constant 2.500000e-01 : f32
    %13 = vector.broadcast %cst_15 : f32 to vector<2x3x16xf32>
    %14 = arith.mulf %12, %13 : vector<2x3x16xf32>
    %cst_16 = arith.constant dense<0xFF800000> : vector<2x3xf32>
    %15 = vector.multi_reduction <maximumf>, %14, %cst_16 [2] : vector<2x3x16xf32> to vector<2x3xf32>
    %16 = vector.shape_cast %15 : vector<2x3xf32> to vector<2x3x1xf32>
    %17 = vector.broadcast %16 : vector<2x3x1xf32> to vector<2x3x16xf32>
    %18 = arith.subf %14, %17 : vector<2x3x16xf32>
    %19 = math.exp %18 : vector<2x3x16xf32>
    %cst_17 = arith.constant dense<0.000000e+00> : vector<2x3xf32>
    %20 = vector.multi_reduction <add>, %19, %cst_17 [2] : vector<2x3x16xf32> to vector<2x3xf32>
    %21 = vector.shape_cast %20 : vector<2x3xf32> to vector<2x3x1xf32>
    %22 = tpu.reciprocal %21 {approx = true} : vector<2x3x1xf32> -> vector<2x3x1xf32>
    %23 = arith.mulf %21, %22 : vector<2x3x1xf32>
    %cst_18 = arith.constant 2.000000e+00 : f32
    %24 = vector.broadcast %cst_18 : f32 to vector<2x3x1xf32>
    %25 = arith.subf %24, %23 : vector<2x3x1xf32>
    %26 = arith.mulf %22, %25 : vector<2x3x1xf32>
    %27 = vector.broadcast %26 : vector<2x3x1xf32> to vector<2x3x16xf32>
    %28 = arith.mulf %19, %27 : vector<2x3x16xf32>
    %c0_19 = arith.constant 0 : index
    %c0_20 = arith.constant 0 : index
    %c0_21 = arith.constant 0 : index
    %29 = vector.load %arg15[%c0_19, %c0_20, %c0_21] : memref<2x3x16xf32, #tpu.memory_space<vmem>>, vector<2x3x16xf32>
    tpu.vector_store %arg15[%c0_19, %c0_20, %c0_21], %28 {strides = array<i32>} : memref<2x3x16xf32, #tpu.memory_space<vmem>>, vector<2x3x16xf32>,
    "tpu.trace_start"() <{level = 10 : i32, message = "bhn,bni->bhi"}> : () -> ()
    %cst_22 = arith.constant dense<0.000000e+00> : vector<2x3x48xf32>
    %30 = tpu.matmul %28, %10, %cst_22 {dimension_numbers = #tpu.dot_dimension_numbers<[2], [1], [1], [2], [0, 0, 0, 1, 1, 2], [0], [0]>} : vector<2x3x16xf32>, vector<2x16x48xf32>, vector<2x3x48xf32> -> vector<2x3x48xf32>
    "tpu.trace_stop"() : () -> ()
    %c0_23 = arith.constant 0 : index
    %c0_24 = arith.constant 0 : index
    %31 = vector.load %arg5[%c0_23, %c0_24] : memref<3x48xf32, #tpu.memory_space<vmem>>, vector<3x48xf32>
    %32 = vector.shape_cast %31 : vector<3x48xf32> to vector<1x3x48xf32>
    %33 = vector.broadcast %32 : vector<1x3x48xf32> to vector<2x3x48xf32>
    %34 = arith.mulf %30, %33 : vector<2x3x48xf32>
    %cst_25 = arith.constant dense<0.000000e+00> : vector<2x48xf32>
    %35 = vector.multi_reduction <add>, %34, %cst_25 [1] : vector<2x3x48xf32> to vector<2x48xf32>
    %c0_26 = arith.constant 0 : index
    %c0_27 = arith.constant 0 : index
    %36 = vector.load %arg8[%c0_26, %c0_27] : memref<48x32xf32, #tpu.memory_space<vmem>>, vector<48x32xf32>
    %cst_28 = arith.constant dense<0.000000e+00> : vector<2x32xf32>
    %37 = tpu.matmul %35, %36, %cst_28 {dimension_numbers = #tpu.dot_dimension_numbers<[1], [0], [0], [1], [0, 0, 1, 1], [], []>} : vector<2x48xf32>, vector<48x32xf32>, vector<2x32xf32> -> vector<2x32xf32>
    %c0_29 = arith.constant 0 : index
    %c0_30 = arith.constant 0 : index
    %38 = vector.load %arg9[%c0_29, %c0_30] : memref<1x32xf32, #tpu.memory_space<vmem>>, vector<1x32xf32>
    %39 = vector.broadcast %38 : vector<1x32xf32> to vector<2x32xf32>
    %40 = arith.addf %37, %39 : vector<2x32xf32>
    %c0_31 = arith.constant 0 : index
    %c0_32 = arith.constant 0 : index
    %41 = vector.load %arg10[%c0_31, %c0_32] : memref<32x64xf32, #tpu.memory_space<vmem>>, vector<32x64xf32>
    %cst_33 = arith.constant dense<0.000000e+00> : vector<2x64xf32>
    %42 = tpu.matmul %40, %41, %cst_33 {dimension_numbers = #tpu.dot_dimension_numbers<[1], [0], [0], [1], [0, 0, 1, 1], [], []>} : vector<2x32xf32>, vector<32x64xf32>, vector<2x64xf32> -> vector<2x64xf32>
    %c0_34 = arith.constant 0 : index
    %c0_35 = arith.constant 0 : index
    %43 = vector.load %arg11[%c0_34, %c0_35] : memref<1x64xf32, #tpu.memory_space<vmem>>, vector<1x64xf32>
    %44 = vector.broadcast %43 : vector<1x64xf32> to vector<2x64xf32>
    %45 = arith.addf %42, %44 : vector<2x64xf32>
    %46 = arith.mulf %45, %45 : vector<2x64xf32>
    %47 = arith.mulf %45, %46 : vector<2x64xf32>
    %cst_36 = arith.constant 4.471500e-02 : f32
    %48 = vector.broadcast %cst_36 : f32 to vector<2x64xf32>
    %49 = arith.mulf %48, %47 : vector<2x64xf32>
    %50 = arith.addf %45, %49 : vector<2x64xf32>
    %cst_37 = arith.constant 0.797884583 : f32
    %51 = vector.broadcast %cst_37 : f32 to vector<2x64xf32>
    %52 = arith.mulf %51, %50 : vector<2x64xf32>
    %53 = math.tanh %52 : vector<2x64xf32>
    %cst_38 = arith.constant 1.000000e+00 : f32
    %54 = vector.broadcast %cst_38 : f32 to vector<2x64xf32>
    %55 = arith.addf %54, %53 : vector<2x64xf32>
    %cst_39 = arith.constant 5.000000e-01 : f32
    %56 = vector.broadcast %cst_39 : f32 to vector<2x64xf32>
    %57 = arith.mulf %56, %55 : vector<2x64xf32>
    %58 = arith.mulf %45, %57 : vector<2x64xf32>
    %c0_40 = arith.constant 0 : index
    %c0_41 = arith.constant 0 : index
    %59 = vector.load %arg12[%c0_40, %c0_41] : memref<64x32xf32, #tpu.memory_space<vmem>>, vector<64x32xf32>
    %cst_42 = arith.constant dense<0.000000e+00> : vector<2x32xf32>
    %60 = tpu.matmul %58, %59, %cst_42 {dimension_numbers = #tpu.dot_dimension_numbers<[1], [0], [0], [1], [0, 0, 1, 1], [], []>} : vector<2x64xf32>, vector<64x32xf32>, vector<2x32xf32> -> vector<2x32xf32>
    %61 = arith.addf %40, %60 : vector<2x32xf32>
    %c0_43 = arith.constant 0 : index
    %c0_44 = arith.constant 0 : index
    %62 = vector.load %arg13[%c0_43, %c0_44] : memref<1x32xf32, #tpu.memory_space<vmem>>, vector<1x32xf32>
    %63 = vector.broadcast %62 : vector<1x32xf32> to vector<2x32xf32>
    %64 = arith.addf %61, %63 : vector<2x32xf32>
    %c0_45 = arith.constant 0 : index
    %c0_46 = arith.constant 0 : index
    %65 = vector.load %arg14[%c0_45, %c0_46] : memref<2x32xf32, #tpu.memory_space<vmem>>, vector<2x32xf32>
    tpu.vector_store %arg14[%c0_45, %c0_46], %64 {strides = array<i32>} : memref<2x32xf32, #tpu.memory_space<vmem>>, vector<2x32xf32>,
    return
  }
  func.func @transform_0(%arg0: i32) -> (i32, i32) {
    %c0_i32 = arith.constant 0 : i32
    %c0_i32_0 = arith.constant 0 : i32
    %c0_i32_1 = arith.constant 0 : i32
    return %c0_i32, %c0_i32_0 : i32, i32
  }
  func.func @transform_1(%arg0: i32) -> (i32, i32) {
    %c0_i32 = arith.constant 0 : i32
    %c0_i32_0 = arith.constant 0 : i32
    %c0_i32_1 = arith.constant 0 : i32
    return %c0_i32, %c0_i32_0 : i32, i32
  }
  func.func @transform_2(%arg0: i32) -> (i32, i32) {
    %c0_i32 = arith.constant 0 : i32
    %c0_i32_0 = arith.constant 0 : i32
    %c0_i32_1 = arith.constant 0 : i32
    return %c0_i32, %c0_i32_0 : i32, i32
  }
  func.func @transform_3(%arg0: i32) -> (i32, i32, i32) {
    %c0_i32 = arith.constant 0 : i32
    %c0_i32_0 = arith.constant 0 : i32
    %c0_i32_1 = arith.constant 0 : i32
    %c0_i32_2 = arith.constant 0 : i32
    return %c0_i32, %c0_i32_0, %c0_i32_1 : i32, i32, i32
  }
  func.func @transform_4(%arg0: i32) -> (i32, i32) {
    %c0_i32 = arith.constant 0 : i32
    %c0_i32_0 = arith.constant 0 : i32
    %c0_i32_1 = arith.constant 0 : i32
    return %c0_i32, %c0_i32_0 : i32, i32
  }
  func.func @transform_5(%arg0: i32) -> (i32, i32) {
    %c0_i32 = arith.constant 0 : i32
    %c0_i32_0 = arith.constant 0 : i32
    %c0_i32_1 = arith.constant 0 : i32
    return %c0_i32, %c0_i32_0 : i32, i32
  }
  func.func @transform_6(%arg0: i32) -> (i32, i32) {
    %c0_i32 = arith.constant 0 : i32
    %c0_i32_0 = arith.constant 0 : i32
    %c0_i32_1 = arith.constant 0 : i32
    return %c0_i32, %c0_i32_0 : i32, i32
  }
  func.func @transform_7(%arg0: i32) -> (i32, i32) {
    %c0_i32 = arith.constant 0 : i32
    %c0_i32_0 = arith.constant 0 : i32
    %c0_i32_1 = arith.constant 0 : i32
    return %c0_i32, %c0_i32_0 : i32, i32
  }
  func.func @transform_8(%arg0: i32) -> (i32, i32) {
    %c0_i32 = arith.constant 0 : i32
    %c0_i32_0 = arith.constant 0 : i32
    %c0_i32_1 = arith.constant 0 : i32
    return %c0_i32, %c0_i32_0 : i32, i32
  }
  func.func @transform_9(%arg0: i32) -> (i32, i32) {
    %c0_i32 = arith.constant 0 : i32
    %c0_i32_0 = arith.constant 0 : i32
    %c0_i32_1 = arith.constant 0 : i32
    return %c0_i32, %c0_i32_0 : i32, i32
  }
  func.func @transform_10(%arg0: i32) -> (i32, i32) {
    %c0_i32 = arith.constant 0 : i32
    %c0_i32_0 = arith.constant 0 : i32
    %c0_i32_1 = arith.constant 0 : i32
    return %c0_i32, %c0_i32_0 : i32, i32
  }
  func.func @transform_11(%arg0: i32) -> (i32, i32) {
    %c0_i32 = arith.constant 0 : i32
    %c0_i32_0 = arith.constant 0 : i32
    %c0_i32_1 = arith.constant 0 : i32
    return %c0_i32, %c0_i32_0 : i32, i32
  }
  func.func @transform_12(%arg0: i32) -> (i32, i32) {
    %c0_i32 = arith.constant 0 : i32
    %c0_i32_0 = arith.constant 0 : i32
    %c0_i32_1 = arith.constant 0 : i32
    return %c0_i32, %c0_i32_0 : i32, i32
  }
  func.func @transform_13(%arg0: i32) -> (i32, i32) {
    %c0_i32 = arith.constant 0 : i32
    %c0_i32_0 = arith.constant 0 : i32
    %c0_i32_1 = arith.constant 0 : i32
    return %c0_i32, %c0_i32_0 : i32, i32
  }
  func.func @transform_14(%arg0: i32) -> (i32, i32, i32) {
    %c0_i32 = arith.constant 0 : i32
    %c0_i32_0 = arith.constant 0 : i32
    %c0_i32_1 = arith.constant 0 : i32
    %c0_i32_2 = arith.constant 0 : i32
    return %c0_i32, %c0_i32_0, %c0_i32_1 : i32, i32, i32
  }
}

</mosaic_0001>

<bundles_post_ra>
// kernel: tile.19
= control target key start
LH: loop header
LB: loop body
LE: loop exit
PB: predicated region body
PF: predicated region fallthrough
CT: control target
= control target key end

     0   :  { %vm17_vm0 = vcmask 130048   ;;  %s45_s12 = smov 16   ;;  %vm23_vm1 = vcmask 392448   ;;  %vm29_vm2 = vcmask 261248   ;;  %s68_s0 = inlined_call_operand.vmem [shape: f32[3,3,16], index: 0, kind: input, shape index: {}]   ;;  %s69_s1 = inlined_call_operand.vmem [shape: f32[3,48], index: 1, kind: output, shape index: {}]  }
   0x1   :  { %v40_v0 = vld [vmem:[%s68_s0 + $0x8] sm:$0xf]  ;;  %v41_v1 = vld [vmem:[%s68_s0 + $0x4] sm:$0xf]  ;;  %v14_v2 = vld [vmem:[%s68_s0] sm:$0xf] }
   0x2   :  { %9 = vst [vmem:[#allocation1 + $0x10] sm:$0xf] %v40_v0  ;;  %13 = vst [vmem:[#allocation1 + $0x8] sm:$0xf] %v41_v1  ;;  %s44_s0 = smov 32  }
   0x3   :  { %15 = vst [vmem:[#allocation1] sm:$0xf] %v14_v2 }
   0xa   :  { %v20_v3 = vld [vmem:[#allocation1 + $0x2] ss:$8 sm:$0x7]   ;;  %v16_v4 = vld [vmem:[#allocation1] ss:$8 sm:$0x7]  }
   0xb   :  { %21 = vrot.lane.b32.xlu0 %v20_v3, %s44_s0  ;;  %v26_v5 = vld [vmem:[#allocation1 + $0x1] ss:$8 sm:$0x7]   ;;  %18 = vst.msk [vmem:[#allocation0] sm:$0x7] %vm17_vm0, %v16_v4  }
   0xf   :  { %27 = vrot.lane.b32.xlu0 %v26_v5, %s45_s12 }
  0x7d   :  { %v22_v6 = vpop.permute.xlu0 %21  }
  0x7e   :  { %24 = vst.msk [vmem:[#allocation0] sm:$0x7] %vm23_vm1, %v22_v6  }
  0x81   :  { %v28_v7 = vpop.permute.xlu0 %27  }
  0x82   :  { %30 = vst.msk [vmem:[#allocation0] sm:$0x7] %vm29_vm2, %v28_v7  }
  0x89   :  { %v35_v8 = vld [vmem:[#allocation0] sm:$0xf] }
  0x8a   :  { %38 = vst [vmem:[%s69_s1] sm:$0xf] %v35_v8 }

// kernel: token_head_forward.1
= control target key start
LH: loop header
LB: loop body
LE: loop exit
PB: predicated region body
PF: predicated region fallthrough
CT: control target
= control target key end

     0   :  { %vm63_vm0 = vcmask 523264   ;;  %s1546_s0 = inlined_call_operand.vmem [shape: f32[32,64], index: 0, kind: input, shape index: {}]   ;;  %s1547_s1 = inlined_call_operand.vmem [shape: f32[64,32], index: 1, kind: input, shape index: {}]   ;;  %s1548_s2 = inlined_call_operand.vmem [shape: f32[32,32], index: 2, kind: input, shape index: {}]   ;;  %s1549_s3 = inlined_call_operand.vmem [shape: f32[2,3,48], index: 3, kind: input, shape index: {}]   ;;  %s1550_s4 = inlined_call_operand.vmem [shape: f32[3,48], index: 4, kind: input, shape index: {}]   ;;  %s1551_s5 = inlined_call_operand.vmem [shape: f32[32,48], index: 5, kind: input, shape index: {}]   ;;  %s1552_s6 = inlined_call_operand.vmem [shape: f32[32,48], index: 6, kind: input, shape index: {}]   ;;  %s1553_s7 = inlined_call_operand.vmem [shape: f32[48,32], index: 7, kind: input, shape index: {}]   ;;  %s1554_s8 = inlined_call_operand.vmem [shape: f32[1,32], index: 8, kind: input, shape index: {}]   ;;  %s1555_s9 = inlined_call_operand.vmem [shape: f32[32,64], index: 9, kind: input, shape index: {}]   ;;  %s1556_s10 = inlined_call_operand.vmem [shape: f32[1,64], index: 10, kind: input, shape index: {}]   ;;  %s1557_s11 = inlined_call_operand.vmem [shape: f32[64,32], index: 11, kind: input, shape index: {}]   ;;  %s1558_s12 = inlined_call_operand.vmem [shape: f32[1,32], index: 12, kind: input, shape index: {}]   ;;  %s1559_s13 = inlined_call_operand.hbm [shape: f32[2,32], index: 13, kind: output, shape index: {0}]   ;;  %s1560_s14 = inlined_call_operand.vmem [shape: f32[2,3,16], index: 14, kind: output, shape index: {1}]  }
   0x1   :  { %v58_v0 = vld [vmem:[%s1547_s1 + $0x38] sm:$0xff]  ;;  %v57_v1 = vld [vmem:[%s1547_s1 + $0x30] sm:$0xff]  ;;  %v56_v2 = vld [vmem:[%s1547_s1 + $0x28] sm:$0xff] }
   0x2   :  { %1090 = vmatprep.subr.mxu0 %v58_v0  ;;  %v47_v3 = vld [vmem:[%s1546_s0] sm:$0xff]  ;;  %v266_v5 = vld [vmem:[%s1552_s6 + $0x18] sm:$0xff] }
   0x3   :  { %1091 = vmatpush3.msra.mxu0 %v58_v0  ;;  %1106 = vmatprep.mubr.msk.f32.mxu0 %vm63_vm0, %v47_v3  ;;  %v55_v4 = vld [vmem:[%s1547_s1 + $0x20] sm:$0xff] }
   0x4   :  { %1092 = vmatprep.subr.mxu0 %v57_v1  ;;  %1126 = vmatprep.subr.mxu1 %v266_v5 }
   0x5   :  { %1093 = vmatpush3.msra.mxu0 %v57_v1 }
   0x6   :  { %1094 = vmatprep.subr.mxu0 %v56_v2 }
   0x7   :  { %20 = vsyncpa [#allocation3], 0  ;;  %1095 = vmatpush3.msra.mxu0 %v56_v2  ;;  %v54_v6 = vld [vmem:[%s1547_s1 + $0x18] sm:$0xff]  ;;  %1127 = vmatpush3.msra.mxu1 %v266_v5  ;;  %v53_v7 = vld [vmem:[%s1547_s1 + $0x10] sm:$0xff]  ;;  %vm165_vm1 = vcmask 261120   ;;  %v1248_v32 = vmov 0.0  }
   0x8   :  { %1096 = vmatprep.subr.mxu0 %v55_v4  ;;  %v52_v8 = vld [vmem:[%s1547_s1 + $0x8] sm:$0xff]  ;;  %v51_v9 = vld [vmem:[%s1547_s1] sm:$0xff]  ;;  %v164_v11 = vld [vmem:[%s1551_s5 + $0x18] sm:$0xff]  ;;  %vm1249_vm2 = vmmov 0   ;;  %vm354_vm3 = vcmask 392192   ;;  %vm515_vm4 = vcmask 124928  }
   0x9   :  { %1097 = vmatpush3.msra.mxu0 %v55_v4  ;;  %v48_v10 = vld [vmem:[%s1546_s0 + $0x8] sm:$0xff]  ;;  %v49_v12 = vld [vmem:[%s1546_s0 + $0x10] sm:$0xff]  ;;  %v50_v13 = vld [vmem:[%s1546_s0 + $0x18] sm:$0xff]  ;;  %vm546_vm5 = vcmask 130048   ;;  %vm696_vm6 = vcmask 387072   ;;  %vm726_vm7 = vcmask 1041409  }
   0xa   :  { %1098 = vmatprep.subr.mxu0 %v54_v6  ;;  %v163_v14 = vld [vmem:[%s1551_s5 + $0x10] sm:$0xff]  ;;  %v162_v16 = vld [vmem:[%s1551_s5 + $0x8] sm:$0xff]  ;;  %v161_v18 = vld [vmem:[%s1551_s5] sm:$0xff]  ;;  %vm983_vm8 = vcmask 254976  }
   0xb   :  { %1099 = vmatpush3.msra.mxu0 %v54_v6  ;;  %v265_v15 = vld [vmem:[%s1552_s6 + $0x10] sm:$0xff]  ;;  %v264_v17 = vld [vmem:[%s1552_s6 + $0x8] sm:$0xff]  ;;  %v263_v19 = vld [vmem:[%s1552_s6] sm:$0xff] }
   0xc   :  { %1100 = vmatprep.subr.mxu0 %v53_v7  ;;  %1128 = vmatprep.subr.mxu1 %v265_v15  ;;  %v59_v21 = vld [vmem:[%s1548_s2] sm:$0xff]  ;;  %v60_v22 = vld [vmem:[%s1548_s2 + $0x8] sm:$0xff]  ;;  %v61_v27 = vld [vmem:[%s1548_s2 + $0x10] sm:$0xff] }
   0xd   :  { %1101 = vmatpush3.msra.mxu0 %v53_v7  ;;  %1129 = vmatpush3.msra.mxu1 %v265_v15  ;;  %v62_v28 = vld [vmem:[%s1548_s2 + $0x18] sm:$0xff]  ;;  %v352_v37 = vld [vmem:[%s1549_s3] sm:$0x7]  ;;  %v353_v40 = vld [vmem:[%s1549_s3 + $0x4] sm:$0x7] }
   0xe   :  { %1102 = vmatprep.subr.mxu0 %v52_v8  ;;  %1130 = vmatprep.subr.mxu1 %v264_v17  ;;  %v803_v15 = vld [vmem:[%s1555_s9 + $0x18] sm:$0xff] }
   0xf   :  { %1103 = vmatpush3.msra.mxu0 %v52_v8  ;;  %1131 = vmatpush3.msra.mxu1 %v264_v17  ;;  %v693_v17 = vld [vmem:[%s1550_s4] sm:$0x7] }
  0x10   :  { %1104 = vmatprep.subr.mxu0 %v51_v9  ;;  %1132 = vmatprep.subr.mxu1 %v263_v19 }
  0x11   :  { %1105 = vmatpush3.msra.mxu0 %v51_v9  ;;  %1133 = vmatpush3.msra.mxu1 %v263_v19  ;;  %v716_v9 = vld [vmem:[%s1553_s7 + $0x28] sm:$0xff] }
  0x12   :  { %1107 = vmatmul.mubr.msk.f32.vlgmr.msra.gmra.mxu0 %vm63_vm0, %v48_v10  ;;  %1112 = vmatprep.subr.mxu0 %v164_v11  ;;  %v715_v10 = vld [vmem:[%s1553_s7 + $0x20] sm:$0xff] }
  0x13   :  { %1109 = vmatprep.mubr.msk.f32.mxu0 %vm63_vm0, %v49_v12  ;;  %1113 = vmatpush3.msra.mxu0 %v164_v11  ;;  %v714_v11 = vld [vmem:[%s1553_s7 + $0x18] sm:$0xff]  ;;  %v713_v12 = vld [vmem:[%s1553_s7 + $0x10] sm:$0xff] }
  0x14   :  { %1114 = vmatprep.subr.mxu0 %v163_v14  ;;  %1147 = vmatprep.subr.mxu1 %v1248_v32 }
  0x15   :  { %1115 = vmatpush3.msra.mxu0 %v163_v14  ;;  %v711_v14 = vld [vmem:[%s1553_s7] sm:$0xff] }
  0x16   :  { %1110 = vmatmul.mubr.msk.f32.gmra.mxu0 %vm63_vm0, %v50_v13  ;;  %1116 = vmatprep.subr.mxu0 %v162_v16  ;;  %v712_v13 = vld [vmem:[%s1553_s7 + $0x8] sm:$0xff] }
  0x17   :  { %1117 = vmatpush3.msra.mxu0 %v162_v16  ;;  %v802_v16 = vld [vmem:[%s1555_s9 + $0x10] sm:$0xff] }
  0x18   :  { %1118 = vmatprep.subr.mxu0 %v161_v18 }
  0x19   :  { %1119 = vmatpush3.msra.mxu0 %v161_v18 }
  0x1a   :  { %1140 = vmatprep.subr.mxu0 %v1248_v32 }
  0xd2   :  { %v1108_v20 = vpop.f32.mrf.mxu0 }
  0xd3   :  { %v148_v25 = vadd.f32 %v1108_v20, %v60_v22 }
  0xd4   :  { %v142_v23 = vpop.f32.mrf.mxu0 }
  0xd5   :  { %v143_v24 = vadd.f32 %v142_v23, %v59_v21 }
  0xd6   :  { %v1111_v26 = vpop.f32.mrf.mxu0 }
  0xd7   :  { %1120 = vmatprep.mubr.msk.f32.mxu0 %vm165_vm1, %v143_v24  ;;  %1134 = vmatprep.mubr.msk.f32.mxu1 %vm165_vm1, %v143_v24  ;;  %v158_v31 = vadd.f32 %v1111_v26, %v62_v28 }
  0xd8   :  { %v152_v29 = vpop.f32.mrf.mxu0  ;;  %1121 = vmatmul.mubr.msk.f32.vlgmr.msra.gmra.mxu0 %vm165_vm1, %v148_v25  ;;  %1135 = vmatmul.mubr.msk.f32.vlgmr.msra.gmra.mxu1 %vm165_vm1, %v148_v25 }
  0xd9   :  { %v153_v30 = vadd.f32 %v152_v29, %v61_v27 }
  0xdb   :  { %1123 = vmatprep.mubr.msk.f32.mxu0 %vm165_vm1, %v153_v30  ;;  %1137 = vmatprep.mubr.msk.f32.mxu1 %vm165_vm1, %v153_v30 }
  0xdc   :  { %1124 = vmatmul.mubr.msk.f32.gmra.mxu0 %vm165_vm1, %v158_v31  ;;  %1138 = vmatmul.mubr.msk.f32.gmra.mxu1 %vm165_vm1, %v158_v31 }
  0xdd   :  { %1144 = vmatprep.mubr.msk.f32.mxu0 %vm1249_vm2, %v1248_v32  ;;  %1151 = vmatprep.mubr.msk.f32.mxu1 %vm1249_vm2, %v1248_v32 }
 0x198   :  { %v1122_v33 = vpop.f32.mrf.mxu0  ;;  %v1136_v34 = vpop.f32.mrf.mxu1 }
 0x199   :  { %1141 = vmatpush3.xpose.msk.msra.mxu0 %vm354_vm3, %v1122_v33 }
 0x19a   :  { %v244_v35 = vpop.f32.mrf.mxu0  ;;  %1142 = vmatprep.subr.mxu0 %v1248_v32  ;;  %v333_v38 = vpop.f32.mrf.mxu1 }
 0x19c   :  { %v1125_v36 = vpop.f32.mrf.mxu0  ;;  %v1139_v41 = vpop.f32.mrf.mxu1 }
 0x19d   :  { %1143 = vmatpush3.xpose.msk.msra.mxu0 %vm354_vm3, %v244_v35  ;;  %1148 = vmatpush3.xpose.msk.msra.mxu1 %vm354_vm3, %v1125_v36 }
 0x19e   :  { %1149 = vmatprep.subr.mxu1 %v1248_v32  ;;  %1154 = vmatprep.subr.mxu0 %v1248_v32  ;;  %v254_v39 = vpop.f32.mrf.mxu0  ;;  %v343_v42 = vpop.f32.mrf.mxu1 }
 0x1a0   :  { %1145 = vmatmul.mubr.msk.f32.vlgmr.msra.gmra.mxu0 %vm354_vm3, %v352_v37 }
 0x1a1   :  { %1150 = vmatpush3.xpose.msk.msra.mxu1 %vm354_vm3, %v254_v39  ;;  %1155 = vmatpush3.msra.mxu0 %v1136_v34 }
 0x1a2   :  { %1156 = vmatprep.subr.mxu0 %v1248_v32  ;;  %1161 = vmatprep.subr.mxu1 %v1248_v32 }
 0x1a3   :  { %1157 = vmatpush3.msra.mxu0 %v333_v38  ;;  %1158 = vmatprep.mubr.msk.f32.mxu0 %vm1249_vm2, %v1248_v32 }
 0x1a4   :  { %1152 = vmatmul.mubr.msk.f32.vlgmr.msra.gmra.mxu1 %vm354_vm3, %v353_v40  ;;  %1168 = vmatprep.subr.mxu0 %v1248_v32  ;;  %v801_v40 = vld [vmem:[%s1555_s9 + $0x8] sm:$0xff] }
 0x1a5   :  { %1162 = vmatpush3.msra.mxu1 %v1139_v41  ;;  %1165 = vmatprep.mubr.msk.f32.mxu1 %vm1249_vm2, %v1248_v32  ;;  %v800_v41 = vld [vmem:[%s1555_s9] sm:$0xff] }
 0x1a6   :  { %1163 = vmatprep.subr.mxu1 %v1248_v32 }
 0x1a7   :  { %1164 = vmatpush3.msra.mxu1 %v343_v42  ;;  %v1023_v42 = vld [vmem:[%s1554_s8] ss:$0 sm:$0xff] }
 0x1a8   :  { %1183 = vmatprep.subr.mxu1 %v1248_v32 }
 0x260   :  { %v430_v43 = vpop.f32.mrf.mxu0 }
 0x261   :  { %v513_v44 = vmul.f32 0.25, %v430_v43 }
 0x262   :  { %v1146_v45 = vpop.f32.mrf.mxu0 }
 0x263   :  { %v516_v46 = vsel %vm515_vm4, %v513_v44, -inf }
 0x264   :  { %v509_v47 = vpop.f32.mrf.mxu1  ;;  %517 = vmax.xlane.f32.xlu0 %v516_v46  ;;  %v900_v46 = vld [vmem:[%s1557_s11 + $0x38] sm:$0xff] }
 0x265   :  { %v514_v48 = vmul.f32 0.25, %v509_v47  ;;  %v899_v47 = vld [vmem:[%s1557_s11 + $0x30] sm:$0xff] }
 0x266   :  { %v1153_v49 = vpop.f32.mrf.mxu1 }
 0x267   :  { %v519_v50 = vsel %vm515_vm4, %v514_v48, -inf  ;;  %v897_v49 = vld [vmem:[%s1557_s11 + $0x20] sm:$0xff] }
 0x268   :  { %520 = vmax.xlane.f32.xlu0 %v519_v50  ;;  %v896_v50 = vld [vmem:[%s1557_s11 + $0x18] sm:$0xff] }
 0x2ed   :  { %v518_v51 = vpop.xlane.xlu0 %517 }
 0x2ee   :  { %v522_v52 = vsub.f32 %v513_v44, %v518_v51  ;;  %v895_v51 = vld [vmem:[%s1557_s11 + $0x10] sm:$0xff] }
 0x2f0   :  { %v524_v53 = vmul.f32 1.442695, %v522_v52  ;;  %v894_v52 = vld [vmem:[%s1557_s11 + $0x8] sm:$0xff] }
 0x2f1   :  { %v521_v54 = vpop.xlane.xlu0 %520 }
 0x2f2   :  { %1216 = vpow2.f32 %v524_v53  ;;  %v523_v55 = vsub.f32 %v514_v48, %v521_v54  ;;  %v898_v48 = vld [vmem:[%s1557_s11 + $0x28] sm:$0xff]  ;;  %v893_v53 = vld [vmem:[%s1557_s11] sm:$0xff] }
 0x2f3   :  { %v1025_v54 = vld [vmem:[%s1556_s10] ss:$0 sm:$0xff]  ;;  %s1250_s10 = smov [#allocation2]  }
 0x2f4   :  { %v526_v56 = vmul.f32 1.442695, %v523_v55  ;;  %s991_s24 = sshll.u32 %s1250_s10, 4  ;;  %s992_s24 = int_to_ptr.vmem [resolvable:$true] %s991_s24 }
 0x2f5   :  { %s1226_s25 = scalar_lea.vmem %s992_s24, 32  ;;  %p1231_p1 = scmp.lt.s32.totalorder %s992_s24, %s992_s24 }
 0x2f6   :  { %1218 = vpow2.f32 %v526_v56  ;;  %p1227_p0 = scmp.ne.s32.totalorder %s992_s24, %s1226_s25  ;;  %p1232_p2 = scmp.lt.s32.totalorder %s1226_s25, %s1226_s25 }
 0x2f8   :  { %p1233_p3 = por %p1232_p2, %p1231_p1 }
 0x2fa   :  { %p1234_p4 = pnand %p1233_p3, %p1227_p0 }
 0x2ff   :  { %v1217_v57 = vpop.eup %1216 }
 0x300   :  { %v528_v58 = vsel %vm515_vm4, %v1217_v57, 0.0 }
 0x301   :  { %529 = vadd.xlane.f32.xlu1 %v528_v58 }
 0x303   :  { %v1219_v59 = vpop.eup %1218 }
 0x304   :  { %v531_v60 = vsel %vm515_vm4, %v1219_v59, 0.0 }
 0x305   :  { %532 = vadd.xlane.f32.xlu1 %v531_v60 }
 0x38a   :  { %v530_v61 = vpop.xlane.xlu1 %529 }
 0x38b   :  { %1220 = vrcp.f32 %v530_v61 }
 0x38e   :  { %v533_v62 = vpop.xlane.xlu1 %532 }
 0x38f   :  { %1222 = vrcp.f32 %v533_v62 }
 0x398   :  { %v1221_v63 = vpop.eup %1220 }
 0x399   :  { %v536_v0 = vmul.f32 %v1221_v63, %v530_v61 }
 0x39b   :  { %v538_v1 = vsub.f32 2.0, %v536_v0 }
 0x39c   :  { %v1223_v2 = vpop.eup %1222 }
 0x39d   :  { %v540_v3 = vmul.f32 %v1221_v63, %v538_v1  ;;  %v537_v4 = vmul.f32 %v1223_v2, %v533_v62 }
 0x39f   :  { %v542_v5 = vmul.f32 %v1217_v57, %v540_v3  ;;  %v539_v6 = vsub.f32 2.0, %v537_v4  ;;  %v1028_v3 = vld [vmem:[%s1558_s12] ss:$0 sm:$0xff] }
 0x3a1   :  { %544 = vst.msk [vmem:[%s1560_s14] sm:$0x7] %vm515_vm4, %v542_v5  ;;  %v541_v7 = vmul.f32 %v1223_v2, %v539_v6  ;;  %1159 = vmatmul.mubr.msk.f32.vlgmr.msra.gmra.mxu0 %vm546_vm5, %v542_v5 }
 0x3a2   :  { %1180 = vmatprep.mubr.msk.f32.mxu0 %vm1249_vm2, %v1248_v32  ;;  %1169 = vmatpush3.msra.mxu0 %v716_v9 }
 0x3a3   :  { %v543_v8 = vmul.f32 %v1219_v59, %v541_v7  ;;  %1170 = vmatprep.subr.mxu0 %v1248_v32 }
 0x3a4   :  { %1171 = vmatpush3.msra.mxu0 %v715_v10 }
 0x3a5   :  { %545 = vst.msk [vmem:[%s1560_s14 + $0x4] sm:$0x7] %vm515_vm4, %v543_v8  ;;  %1166 = vmatmul.mubr.msk.f32.vlgmr.msra.gmra.mxu1 %vm546_vm5, %v543_v8  ;;  %1172 = vmatprep.subr.mxu0 %v1248_v32 }
 0x3a6   :  { %1191 = vmatprep.mubr.msk.f32.mxu1 %vm1249_vm2, %v1248_v32  ;;  %1173 = vmatpush3.msra.mxu0 %v714_v11 }
 0x3a7   :  { %1174 = vmatprep.subr.mxu0 %v1248_v32  ;;  %1184 = vmatpush3.msra.mxu1 %v803_v15 }
 0x3a8   :  { %1175 = vmatpush3.msra.mxu0 %v713_v12  ;;  %1185 = vmatprep.subr.mxu1 %v1248_v32 }
 0x3a9   :  { %1176 = vmatprep.subr.mxu0 %v1248_v32  ;;  %1186 = vmatpush3.msra.mxu1 %v802_v16 }
 0x3aa   :  { %1177 = vmatpush3.msra.mxu0 %v712_v13  ;;  %1187 = vmatprep.subr.mxu1 %v1248_v32 }
 0x3ab   :  { %1178 = vmatprep.subr.mxu0 %v1248_v32  ;;  %1188 = vmatpush3.msra.mxu1 %v801_v40 }
 0x3ac   :  { %1179 = vmatpush3.msra.mxu0 %v711_v14  ;;  %1189 = vmatprep.subr.mxu1 %v1248_v32 }
 0x3ad   :  { %1190 = vmatpush3.msra.mxu1 %v800_v41 }
 0x3ae   :  { %1194 = vmatprep.subr.mxu1 %v1248_v32 }
 0x461   :  { %v616_v18 = vpop.f32.mrf.mxu0 }
 0x462   :  { %v694_v19 = vmul.f32 %v693_v17, %v616_v18 }
 0x463   :  { %v1160_v20 = vpop.f32.mrf.mxu0 }
 0x464   :  { %v697_v21 = vsel %vm696_vm6, %v694_v19, 0.0 }
 0x465   :  { %v698_v22 = vrot.slane %v697_v21, 4  ;;  %v689_v23 = vpop.f32.mrf.mxu1 }
 0x466   :  { %v695_v24 = vmul.f32 %v693_v17, %v689_v23 }
 0x467   :  { %v699_v25 = vadd.f32 %v698_v22, %v697_v21  ;;  %v1167_v26 = vpop.f32.mrf.mxu1 }
 0x468   :  { %v704_v27 = vsel %vm696_vm6, %v695_v24, 0.0 }
 0x469   :  { %v700_v28 = vrot.slane %v699_v25, 2  ;;  %v705_v29 = vrot.slane %v704_v27, 4 }
 0x46b   :  { %v701_v30 = vadd.f32 %v700_v28, %v699_v25  ;;  %v706_v31 = vadd.f32 %v705_v29, %v704_v27 }
 0x46d   :  { %v707_v33 = vrot.slane %v706_v31, 2  ;;  %v702_v34 = vrot.slane %v701_v30, 1 }
 0x46f   :  { %v708_v35 = vadd.f32 %v707_v33, %v706_v31  ;;  %v703_v37 = vadd.f32 %v702_v34, %v701_v30 }
 0x471   :  { %v709_v36 = vrot.slane %v708_v35, 1 }
 0x473   :  { %v710_v38 = vadd.f32 %v709_v36, %v708_v35 }
 0x475   :  { %v727_v39 = vsel %vm726_vm7, %v710_v38, %v703_v37 }
 0x476   :  { %1181 = vmatmul.mubr.msk.f32.vlgmr.msra.gmra.mxu0 %vm354_vm3, %v727_v39 }
 0x536   :  { %v796_v43 = vpop.f32.mrf.mxu0 }
 0x537   :  { %v797_v44 = vadd.f32 %v1023_v42, %v796_v43 }
 0x538   :  { %v1182_v45 = vpop.f32.mrf.mxu0 }
 0x539   :  { %1192 = vmatmul.mubr.msk.f32.vlgmr.msra.gmra.mxu1 %vm165_vm1, %v797_v44 }
 0x53a   :  { %1210 = vmatprep.mubr.msk.f32.mxu1 %vm1249_vm2, %v1248_v32  ;;  %1195 = vmatpush3.msra.mxu1 %v900_v46 }
 0x53b   :  { %1196 = vmatprep.subr.mxu1 %v1248_v32 }
 0x53c   :  { %1197 = vmatpush3.msra.mxu1 %v899_v47 }
 0x53d   :  { %1198 = vmatprep.subr.mxu1 %v1248_v32 }
 0x53e   :  { %1199 = vmatpush3.msra.mxu1 %v898_v48 }
 0x53f   :  { %1200 = vmatprep.subr.mxu1 %v1248_v32 }
 0x540   :  { %1201 = vmatpush3.msra.mxu1 %v897_v49 }
 0x541   :  { %1202 = vmatprep.subr.mxu1 %v1248_v32 }
 0x542   :  { %1203 = vmatpush3.msra.mxu1 %v896_v50 }
 0x543   :  { %1204 = vmatprep.subr.mxu1 %v1248_v32 }
 0x544   :  { %1205 = vmatpush3.msra.mxu1 %v895_v51 }
 0x545   :  { %1206 = vmatprep.subr.mxu1 %v1248_v32 }
 0x546   :  { %1207 = vmatpush3.msra.mxu1 %v894_v52 }
 0x547   :  { %1208 = vmatprep.subr.mxu1 %v1248_v32 }
 0x548   :  { %1209 = vmatpush3.msra.mxu1 %v893_v53 }
 0x5f9   :  { %v880_v55 = vpop.f32.mrf.mxu1 }
 0x5fa   :  { %v881_v56 = vadd.f32 %v1025_v54, %v880_v55 }
 0x5fb   :  { %v1193_v57 = vpop.f32.mrf.mxu1 }
 0x5fc   :  { %v884_v58 = vmul.f32 %v881_v56, %v881_v56 }
 0x5fe   :  { %v885_v59 = vmul.f32 %v884_v58, %v881_v56 }
 0x600   :  { %v886_v60 = vmul.f32 0.044715, %v885_v59 }
 0x602   :  { %v887_v61 = vadd.f32 %v886_v60, %v881_v56 }
 0x604   :  { %v888_v62 = vmul.f32 0.7978846, %v887_v61 }
 0x606   :  { %1224 = vtanh.f32 %v888_v62 }
 0x613   :  { %v1225_v63 = vpop.eup %1224 }
 0x614   :  { %v890_v32 = vadd.f32 1.0, %v1225_v63 }
 0x616   :  { %v891_v0 = vmul.f32 0.5, %v890_v32 }
 0x618   :  { %v892_v1 = vmul.f32 %v891_v0, %v881_v56 }
 0x61a   :  { %1211 = vmatmul.mubr.msk.f32.vlgmr.msra.gmra.mxu1 %vm63_vm0, %v892_v1 }
 0x6da   :  { %v970_v2 = vpop.f32.mrf.mxu1 }
 0x6db   :  { %v974_v4 = vadd.f32 %v970_v2, %v797_v44 }
 0x6dc   :  { %v1212_v5 = vpop.f32.mrf.mxu1 }
 0x6dd   :  { %v982_v6 = vadd.f32 %v1028_v3, %v974_v4 }
 0x6df   :  { %984 = vst.msk [vmem:[#allocation2] sm:$0x3] %vm983_vm8, %v982_v6 }
 0x6e0   :  { %1237 = shalt.err (!%p1234_p4)
}
 0x6e1   :  { %994 = dma.vmem_to_hbm [thread:$0]  %s992_s24, 32, %s1559_s13, [#allocation3]  }
 0x6e2   :  { %1246 = dma.done.wait [#allocation3], 32  }
 0x6e3   :  { %1247 = vsyncadd [#allocation3], 4294967264 }
 0x6e4   :  { %1002 = vsyncpa [#allocation3], 1 }

</bundles_post_ra>
